<compile_context>
chip_gen: v5e
topology: v5e:2x2
jax: 0.10.0
libtpu: 0.0.40
codegen_flags: <defaults>
</compile_context>

<pallas_src>
import functools

import jax
import jax.numpy as jnp
import numpy as np
from jax import lax
from jax.experimental import pallas as pl
from jax.experimental.pallas import tpu as pltpu


def _mha_kernel(x_ref, wqkv_ref, wp_ref, bp_ref, out_ref,
                q_scr, k_scr, v_scr, *, n_heads, head_size, block_q):
    """One grid step == one (batch, query-tile) pair.

    x_ref    : (T, E)      VMEM, batch dim squeezed (input dtype)
    wqkv_ref : (3, E, E)   VMEM, fused QKV weights (compute dtype)
    wp_ref   : (H, D, E)   VMEM, output-proj weight, pre-transposed, per head
    bp_ref   : (1, E)      VMEM, proj bias (f32)
    out_ref  : (Tq, E)     VMEM, output tile (input dtype)
    q/k/v_scr: (T, E)      VMEM scratch, persists across the q-tile axis
    """
    qi = pl.program_id(1)
    T, E = q_scr.shape
    H, D, TQ = n_heads, head_size, block_q
    dt = wqkv_ref.dtype                       # MXU input dtype (f32 or bf16)

    # ---- once per batch element: fused lane-dense QKV projection ----
    @pl.when(qi == 0)
    def _():
        x = x_ref[...].astype(dt)                                    # (T, E)
        scale = jnp.float32(D ** -0.5)
        q = jnp.dot(x, wqkv_ref[0], preferred_element_type=jnp.float32)
        q_scr[...] = (q * scale).astype(dt)    # fold softmax scale into Q
        k_scr[...] = jnp.dot(x, wqkv_ref[1],
                             preferred_element_type=jnp.float32).astype(dt)
        v_scr[...] = jnp.dot(x, wqkv_ref[2],
                             preferred_element_type=jnp.float32).astype(dt)

    q_start = pl.multiple_of(qi * TQ, TQ)

    # causal mask needed only on the diagonal KV tile (local indices; Tq == Tkv)
    row = lax.broadcasted_iota(jnp.int32, (TQ, TQ), 0)
    col = lax.broadcasted_iota(jnp.int32, (TQ, TQ), 1)
    diag_mask = col <= row
    neg_big = jnp.float32(-1e30)   # finite: every causal row keeps its diagonal

    dn_qk = (((1,), (1,)), ((), ()))   # contract last dims; no materialized k.T

    y = jnp.zeros((TQ, E), jnp.float32)        # output-projection accumulator

    for h in range(H):                          # H is small; static unroll
        lo = h * D
        q = q_scr[pl.ds(q_start, TQ), lo:lo + D]                     # (TQ, D)

        def kv_step(ki, carry, *, masked):
            m_i, l_i, acc = carry
            k_start = pl.multiple_of(ki * TQ, TQ)
            k = k_scr[pl.ds(k_start, TQ), lo:lo + D]                 # (TQ, D)
            v = v_scr[pl.ds(k_start, TQ), lo:lo + D]
            s = lax.dot_general(q, k, dn_qk,
                                preferred_element_type=jnp.float32)  # (TQ, TQ)
            if masked:
                s = jnp.where(diag_mask, s, neg_big)
            m_new = jnp.maximum(m_i, jnp.max(s, axis=-1, keepdims=True))
            alpha = jnp.exp(m_i - m_new)
            p = jnp.exp(s - m_new)
            l_new = alpha * l_i + jnp.sum(p, axis=-1, keepdims=True)
            acc_new = alpha * acc + jnp.dot(p.astype(dt), v,
                                            preferred_element_type=jnp.float32)
            return m_new, l_new, acc_new

        init = (jnp.full((TQ, 1), neg_big, jnp.float32),
                jnp.zeros((TQ, 1), jnp.float32),
                jnp.zeros((TQ, D), jnp.float32))

        # strictly-below-diagonal KV tiles: fully unmasked, no mask work
        m_i, l_i, acc = lax.fori_loop(
            0, qi, functools.partial(kv_step, masked=False), init)
        # diagonal KV tile: apply the causal iota mask
        m_i, l_i, acc = kv_step(qi, (m_i, l_i, acc), masked=True)

        # softmax denominator on the (otherwise idle) EUP slot.
        # NOTE: approx reciprocal -> rows sum to ~1 +/- 1e-3 (fine for inference).
        ctx = acc * pl.reciprocal(l_i, approx=True)                  # (TQ, D) f32
        # fold each head straight into the output projection (lane-dense).
        # NOTE: ctx is rounded to compute dtype before the MXU matmul.
        y = y + jnp.dot(ctx.astype(dt), wp_ref[h],
                        preferred_element_type=jnp.float32)          # (TQ, E)

    out_ref[...] = (y + bp_ref[...]).astype(out_ref.dtype)


def prepare_mha_params(wq, wk, wv, w_proj, b_proj, *, compute_dtype=jnp.bfloat16):
    """One-time weight prep (do at init, not per forward call).

    wq/wk/wv: (H, E, D) per-head weights already transposed (x @ w[h] == q_h)
    w_proj  : (E, E) torch layout (out = cat @ w_proj.T + b_proj)
    b_proj  : (E,)
    Returns (w_qkv (3,E,E), wp_heads (H,D,E), bias (1,E)).
    """
    H, E, D = wq.shape
    assert H * D == E

    def fuse(w):                                   # (H, E, D) -> (E, H*D) = (E, E)
        return jnp.transpose(w, (1, 0, 2)).reshape(E, H * D)

    w_qkv = jnp.stack([fuse(wq), fuse(wk), fuse(wv)], axis=0).astype(compute_dtype)
    wp_heads = jnp.transpose(w_proj).reshape(H, D, E).astype(compute_dtype)
    bias = b_proj.reshape(1, E).astype(jnp.float32)
    return w_qkv, wp_heads, bias


def multi_head_attention(x, w_qkv, wp_heads, bias, *, block_q=None,
                         vmem_limit_bytes=None):
    """x: (B, T, E); (w_qkv, wp_heads, bias) from prepare_mha_params()."""
    B, T, E = x.shape
    H, D, _ = wp_heads.shape
    assert H * D == E and w_qkv.shape == (3, E, E)

    if block_q is None:
        block_q = min(T, 256)
    if T % block_q != 0:
        block_q = T                       # fall back to a single query tile
    num_q = T // block_q

    cbytes = jnp.dtype(w_qkv.dtype).itemsize
    xbytes = jnp.dtype(x.dtype).itemsize

    # VMEM footprint: qkv scratch + double-buffered x/out blocks + weights +
    # headroom for (Tq,Tq) score / softmax / y temporaries.
    vmem_est = (3 * T * E * cbytes
                + 2 * T * E * xbytes
                + 2 * block_q * E * xbytes
                + 2 * (3 * E * E + H * D * E) * cbytes
                + 2 * E * 4
                + 8 * block_q * max(block_q, E) * 4)
    if vmem_limit_bytes is None:
        vmem_limit_bytes = int(min(100 * 1024 * 1024,
                                   max(32 * 1024 * 1024, vmem_est * 3 // 2)))

    flops = int(2 * B * T * E * (3 * E)           # QKV projection
                + 2 * B * T * E * E               # output projection
                + 2 * B * T * T * E)              # QK^T + PV (causal ~ half)
    transcendentals = int(B * H * T * T // 2 + B * H * T)
    bytes_accessed = int(2 * B * T * E * xbytes
                         + (3 * E * E + H * D * E) * cbytes + E * 4)

    kernel = functools.partial(_mha_kernel, n_heads=H, head_size=D,
                               block_q=block_q)

    return pl.pallas_call(
        kernel,
        out_shape=jax.ShapeDtypeStruct((B, T, E), x.dtype),
        grid_spec=pltpu.PrefetchScalarGridSpec(
            num_scalar_prefetch=0,
            grid=(B, num_q),
            in_specs=[
                pl.BlockSpec((None, T, E), lambda b, q: (b, 0, 0)),   # x (full seq per batch)
                pl.BlockSpec((3, E, E), lambda b, q: (0, 0, 0)),      # fused QKV weights
                pl.BlockSpec((H, D, E), lambda b, q: (0, 0, 0)),      # per-head proj weights
                pl.BlockSpec((1, E), lambda b, q: (0, 0)),            # proj bias (f32)
            ],
            out_specs=pl.BlockSpec((None, block_q, E), lambda b, q: (b, q, 0)),
            scratch_shapes=[
                pltpu.VMEM((T, E), w_qkv.dtype),   # Q (pre-scaled), per batch
                pltpu.VMEM((T, E), w_qkv.dtype),   # K
                pltpu.VMEM((T, E), w_qkv.dtype),   # V
            ],
        ),
        compiler_params=pltpu.CompilerParams(
            dimension_semantics=("parallel", "arbitrary"),
            vmem_limit_bytes=vmem_limit_bytes,
        ),
        cost_estimate=pl.CostEstimate(
            flops=flops, transcendentals=transcendentals,
            bytes_accessed=bytes_accessed),
    )(x, w_qkv, wp_heads, bias)


def _reference(x, wq, wk, wv, w_proj, b_proj):
    """Pure-JAX replica of the PyTorch forward (eval mode), f32."""
    H, E, D = wq.shape
    T = x.shape[1]
    mask = jnp.tril(jnp.ones((T, T), dtype=bool))
    outs = []
    for h in range(H):
        q = x @ wq[h]
        k = x @ wk[h]
        v = x @ wv[h]
        wei = (q @ jnp.swapaxes(k, -2, -1)) * (D ** -0.5)
        wei = jnp.where(mask, wei, -jnp.inf)
        wei = jax.nn.softmax(wei, axis=-1)
        outs.append(wei @ v)
    cat = jnp.concatenate(outs, axis=-1)
    return cat @ w_proj.T + b_proj


if __name__ == "__main__":
    def make_inputs(key, B, T, n_heads, head_size):
        E = n_heads * head_size
        kx, kq, kk, kv, kw, kb = jax.random.split(key, 6)
        x = jax.random.normal(kx, (B, T, E), dtype=jnp.float32)
        s = 1.0 / np.sqrt(E)
        wq = jax.random.uniform(kq, (n_heads, E, head_size), jnp.float32, -s, s)
        wk = jax.random.uniform(kk, (n_heads, E, head_size), jnp.float32, -s, s)
        wv = jax.random.uniform(kv, (n_heads, E, head_size), jnp.float32, -s, s)
        w_proj = jax.random.uniform(kw, (E, E), jnp.float32, -s, s)
        b_proj = jax.random.uniform(kb, (E,), jnp.float32, -s, s)
        return x, wq, wk, wv, w_proj, b_proj

    key = jax.random.PRNGKey(0)
    k1, k2 = jax.random.split(key)

    # ---- test 1: tiny shapes (B=2, T=8, n_heads=4, head_size=8, E=32) ----
    x, wq, wk, wv, w_proj, b_proj = make_inputs(k1, B=2, T=8,
                                                n_heads=4, head_size=8)
    ref = _reference(x, wq, wk, wv, w_proj, b_proj)

    pf32 = prepare_mha_params(wq, wk, wv, w_proj, b_proj,
                              compute_dtype=jnp.float32)
    out = jax.block_until_ready(multi_head_attention(x, *pf32))
    assert out.shape == x.shape and out.dtype == x.dtype
    np.testing.assert_allclose(np.asarray(out), np.asarray(ref),
                               rtol=2e-2, atol=2e-2)

    pbf16 = prepare_mha_params(wq, wk, wv, w_proj, b_proj)   # bf16 default
    out = jax.block_until_ready(multi_head_attention(x, *pbf16))
    assert out.shape == x.shape and out.dtype == x.dtype
    np.testing.assert_allclose(np.asarray(out), np.asarray(ref),
                               rtol=1e-1, atol=1e-1)

    # ---- test 2: exercises the q-tiled / causal-KV-skipping flash path ----
    x, wq, wk, wv, w_proj, b_proj = make_inputs(k2, B=2, T=256,
                                                n_heads=2, head_size=64)
    ref = _reference(x, wq, wk, wv, w_proj, b_proj)

    pf32 = prepare_mha_params(wq, wk, wv, w_proj, b_proj,
                              compute_dtype=jnp.float32)
    out = jax.block_until_ready(multi_head_attention(x, *pf32, block_q=64))
    np.testing.assert_allclose(np.asarray(out), np.asarray(ref),
                               rtol=2e-2, atol=2e-2)

    pbf16 = prepare_mha_params(wq, wk, wv, w_proj, b_proj)
    out = jax.block_until_ready(multi_head_attention(x, *pbf16, block_q=64))
    np.testing.assert_allclose(np.asarray(out), np.asarray(ref),
                               rtol=2e-1, atol=1e-1)

    print("KERNEL_OK")
</pallas_src>

<mosaic_0001>
module attributes {stable_mosaic.version = 11 : i64} {
  func.func @_mha_kernel(%arg0: i32, %arg1: i32, %arg2: memref<1x8x32xf32, #tpu.memory_space<vmem>>, %arg3: memref<3x32x32xf32, #tpu.memory_space<vmem>>, %arg4: memref<4x8x32xf32, #tpu.memory_space<vmem>>, %arg5: memref<1x32xf32, #tpu.memory_space<vmem>>, %arg6: memref<1x8x32xf32, #tpu.memory_space<vmem>>, %arg7: memref<8x32xf32, #tpu.memory_space<vmem>>, %arg8: memref<8x32xf32, #tpu.memory_space<vmem>>, %arg9: memref<8x32xf32, #tpu.memory_space<vmem>>) attributes {dimension_semantics = [#tpu.dimension_semantics<parallel>, #tpu.dimension_semantics<arbitrary>], iteration_bounds = array<i64: 2, 1>, scalar_prefetch = 0 : i64, scratch_operands = 3 : i64, tpu.core_type = #tpu.core_type<tc>, window_params = [{transform_indices = @transform_0, window_bounds = array<i64: 1, 8, 32>}, {pipeline_mode = #tpu.pipeline_mode<synchronous>, transform_indices = @transform_1, window_bounds = array<i64: 3, 32, 32>}, {pipeline_mode = #tpu.pipeline_mode<synchronous>, transform_indices = @transform_2, window_bounds = array<i64: 4, 8, 32>}, {pipeline_mode = #tpu.pipeline_mode<synchronous>, transform_indices = @transform_3, window_bounds = array<i64: 1, 32>}, {transform_indices = @transform_4, window_bounds = array<i64: 1, 8, 32>}]} {
    %c0_i32 = arith.constant 0 : i32
    %0 = arith.cmpi eq, %arg1, %c0_i32 : i32
    %1 = arith.extui %0 : i1 to i32
    %c0_i32_0 = arith.constant 0 : i32
    %2 = arith.cmpi ne, %1, %c0_i32_0 : i32
    scf.if %2 {
      %c0_70 = arith.constant 0 : index
      %c0_71 = arith.constant 0 : index
      %c0_72 = arith.constant 0 : index
      %175 = vector.load %arg2[%c0_70, %c0_71, %c0_72] : memref<1x8x32xf32, #tpu.memory_space<vmem>>, vector<1x8x32xf32>
      %176 = vector.shape_cast %175 : vector<1x8x32xf32> to vector<8x32xf32>
      %c0_73 = arith.constant 0 : index
      %c0_74 = arith.constant 0 : index
      %c0_75 = arith.constant 0 : index
      %177 = vector.load %arg3[%c0_73, %c0_74, %c0_75] : memref<3x32x32xf32, #tpu.memory_space<vmem>>, vector<1x32x32xf32>
      %178 = vector.shape_cast %177 : vector<1x32x32xf32> to vector<32x32xf32>
      %cst_76 = arith.constant dense<0.000000e+00> : vector<8x32xf32>
      %179 = tpu.matmul %176, %178, %cst_76 {dimension_numbers = #tpu.dot_dimension_numbers<[1], [0], [0], [1], [0, 0, 1, 1], [], []>} : vector<8x32xf32>, vector<32x32xf32>, vector<8x32xf32> -> vector<8x32xf32>
      %cst_77 = arith.constant 0.353553385 : f32
      %180 = vector.broadcast %cst_77 : f32 to vector<8x32xf32>
      %181 = arith.mulf %179, %180 : vector<8x32xf32>
      %c0_78 = arith.constant 0 : index
      %c0_79 = arith.constant 0 : index
      %182 = vector.load %arg7[%c0_78, %c0_79] : memref<8x32xf32, #tpu.memory_space<vmem>>, vector<8x32xf32>
      tpu.vector_store %arg7[%c0_78, %c0_79], %181 {strides = array<i32>} : memref<8x32xf32, #tpu.memory_space<vmem>>, vector<8x32xf32>,
      %c1_80 = arith.constant 1 : index
      %c0_81 = arith.constant 0 : index
      %c0_82 = arith.constant 0 : index
      %183 = vector.load %arg3[%c1_80, %c0_81, %c0_82] : memref<3x32x32xf32, #tpu.memory_space<vmem>>, vector<1x32x32xf32>
      %184 = vector.shape_cast %183 : vector<1x32x32xf32> to vector<32x32xf32>
      %cst_83 = arith.constant dense<0.000000e+00> : vector<8x32xf32>
      %185 = tpu.matmul %176, %184, %cst_83 {dimension_numbers = #tpu.dot_dimension_numbers<[1], [0], [0], [1], [0, 0, 1, 1], [], []>} : vector<8x32xf32>, vector<32x32xf32>, vector<8x32xf32> -> vector<8x32xf32>
      %c0_84 = arith.constant 0 : index
      %c0_85 = arith.constant 0 : index
      %186 = vector.load %arg8[%c0_84, %c0_85] : memref<8x32xf32, #tpu.memory_space<vmem>>, vector<8x32xf32>
      tpu.vector_store %arg8[%c0_84, %c0_85], %185 {strides = array<i32>} : memref<8x32xf32, #tpu.memory_space<vmem>>, vector<8x32xf32>,
      %c2_86 = arith.constant 2 : index
      %c0_87 = arith.constant 0 : index
      %c0_88 = arith.constant 0 : index
      %187 = vector.load %arg3[%c2_86, %c0_87, %c0_88] : memref<3x32x32xf32, #tpu.memory_space<vmem>>, vector<1x32x32xf32>
      %188 = vector.shape_cast %187 : vector<1x32x32xf32> to vector<32x32xf32>
      %cst_89 = arith.constant dense<0.000000e+00> : vector<8x32xf32>
      %189 = tpu.matmul %176, %188, %cst_89 {dimension_numbers = #tpu.dot_dimension_numbers<[1], [0], [0], [1], [0, 0, 1, 1], [], []>} : vector<8x32xf32>, vector<32x32xf32>, vector<8x32xf32> -> vector<8x32xf32>
      %c0_90 = arith.constant 0 : index
      %c0_91 = arith.constant 0 : index
      %190 = vector.load %arg9[%c0_90, %c0_91] : memref<8x32xf32, #tpu.memory_space<vmem>>, vector<8x32xf32>
      tpu.vector_store %arg9[%c0_90, %c0_91], %189 {strides = array<i32>} : memref<8x32xf32, #tpu.memory_space<vmem>>, vector<8x32xf32>,
    } else {
    }
    %c8_i32 = arith.constant 8 : i32
    %3 = arith.muli %arg1, %c8_i32 : i32
    %4 = tpu.assume_multiple %3, 8 : i32
    %5 = tpu.iota {dimensions = array<i32: 0>} : vector<8x8xi32>
    %6 = tpu.iota {dimensions = array<i32: 1>} : vector<8x8xi32>
    %7 = arith.cmpi sle, %6, %5 : vector<8x8xi32>
    %cst = arith.constant 0.000000e+00 : f32
    %8 = vector.broadcast %cst : f32 to vector<8x32xf32>
    %9 = arith.index_cast %4 : i32 to index
    %c0 = arith.constant 0 : index
    %10 = vector.load %arg7[%9, %c0] : memref<8x32xf32, #tpu.memory_space<vmem>>, vector<8x8xf32>
    %cst_1 = arith.constant -1.000000e+30 : f32
    %11 = vector.broadcast %cst_1 : f32 to vector<8x1xf32>
    %cst_2 = arith.constant 0.000000e+00 : f32
    %12 = vector.broadcast %cst_2 : f32 to vector<8x1xf32>
    %cst_3 = arith.constant 0.000000e+00 : f32
    %13 = vector.broadcast %cst_3 : f32 to vector<8x8xf32>
    %c0_i32_4 = arith.constant 0 : i32
    %14 = arith.subi %arg1, %c0_i32_4 : i32
    %15 = arith.addi %c0_i32_4, %14 : i32
    %c1_i32 = arith.constant 1 : i32
    %16:3 = scf.for %arg10 = %c0_i32_4 to %15 step %c1_i32 iter_args(%arg11 = %11, %arg12 = %12, %arg13 = %13) -> (vector<8x1xf32>, vector<8x1xf32>, vector<8x8xf32>)  : i32 {
      %c8_i32_70 = arith.constant 8 : i32
      %175 = arith.muli %arg10, %c8_i32_70 : i32
      %176 = tpu.assume_multiple %175, 8 : i32
      %177 = arith.index_cast %176 : i32 to index
      %c0_71 = arith.constant 0 : index
      %178 = vector.load %arg8[%177, %c0_71] : memref<8x32xf32, #tpu.memory_space<vmem>>, vector<8x8xf32>
      %179 = arith.index_cast %176 : i32 to index
      %c0_72 = arith.constant 0 : index
      %180 = vector.load %arg9[%179, %c0_72] : memref<8x32xf32, #tpu.memory_space<vmem>>, vector<8x8xf32>
      %cst_73 = arith.constant dense<0.000000e+00> : vector<8x8xf32>
      %181 = tpu.matmul %10, %178, %cst_73 {dimension_numbers = #tpu.dot_dimension_numbers<[1], [1], [0], [0], [0, 0, 1, 0], [], []>} : vector<8x8xf32>, vector<8x8xf32>, vector<8x8xf32> -> vector<8x8xf32>
      %cst_74 = arith.constant dense<0xFF800000> : vector<8xf32>
      %182 = vector.multi_reduction <maximumf>, %181, %cst_74 [1] : vector<8x8xf32> to vector<8xf32>
      %183 = vector.shape_cast %182 : vector<8xf32> to vector<8x1xf32>
      %184 = arith.maximumf %arg11, %183 : vector<8x1xf32>
      %185 = arith.subf %arg11, %184 : vector<8x1xf32>
      %186 = math.exp %185 : vector<8x1xf32>
      %187 = vector.broadcast %184 : vector<8x1xf32> to vector<8x8xf32>
      %188 = arith.subf %181, %187 : vector<8x8xf32>
      %189 = math.exp %188 : vector<8x8xf32>
      %190 = arith.mulf %186, %arg12 : vector<8x1xf32>
      %cst_75 = arith.constant dense<0.000000e+00> : vector<8xf32>
      %191 = vector.multi_reduction <add>, %189, %cst_75 [1] : vector<8x8xf32> to vector<8xf32>
      %192 = vector.shape_cast %191 : vector<8xf32> to vector<8x1xf32>
      %193 = arith.addf %190, %192 : vector<8x1xf32>
      %194 = vector.broadcast %186 : vector<8x1xf32> to vector<8x8xf32>
      %195 = arith.mulf %194, %arg13 : vector<8x8xf32>
      %cst_76 = arith.constant dense<0.000000e+00> : vector<8x8xf32>
      %196 = tpu.matmul %189, %180, %cst_76 {dimension_numbers = #tpu.dot_dimension_numbers<[1], [0], [0], [1], [0, 0, 1, 1], [], []>} : vector<8x8xf32>, vector<8x8xf32>, vector<8x8xf32> -> vector<8x8xf32>
      %197 = arith.addf %195, %196 : vector<8x8xf32>
      scf.yield %184, %193, %197 : vector<8x1xf32>, vector<8x1xf32>, vector<8x8xf32>
    }
    %c8_i32_5 = arith.constant 8 : i32
    %17 = arith.muli %arg1, %c8_i32_5 : i32
    %18 = tpu.assume_multiple %17, 8 : i32
    %19 = arith.index_cast %18 : i32 to index
    %c0_6 = arith.constant 0 : index
    %20 = vector.load %arg8[%19, %c0_6] : memref<8x32xf32, #tpu.memory_space<vmem>>, vector<8x8xf32>
    %21 = arith.index_cast %18 : i32 to index
    %c0_7 = arith.constant 0 : index
    %22 = vector.load %arg9[%21, %c0_7] : memref<8x32xf32, #tpu.memory_space<vmem>>, vector<8x8xf32>
    %cst_8 = arith.constant dense<0.000000e+00> : vector<8x8xf32>
    %23 = tpu.matmul %10, %20, %cst_8 {dimension_numbers = #tpu.dot_dimension_numbers<[1], [1], [0], [0], [0, 0, 1, 0], [], []>} : vector<8x8xf32>, vector<8x8xf32>, vector<8x8xf32> -> vector<8x8xf32>
    %cst_9 = arith.constant -1.000000e+30 : f32
    %24 = vector.broadcast %cst_9 : f32 to vector<8x8xf32>
    %25 = arith.select %7, %23, %24 : vector<8x8xi1>, vector<8x8xf32>
    %cst_10 = arith.constant dense<0xFF800000> : vector<8xf32>
    %26 = vector.multi_reduction <maximumf>, %25, %cst_10 [1] : vector<8x8xf32> to vector<8xf32>
    %27 = vector.shape_cast %26 : vector<8xf32> to vector<8x1xf32>
    %28 = arith.maximumf %16#0, %27 : vector<8x1xf32>
    %29 = arith.subf %16#0, %28 : vector<8x1xf32>
    %30 = math.exp %29 : vector<8x1xf32>
    %31 = vector.broadcast %28 : vector<8x1xf32> to vector<8x8xf32>
    %32 = arith.subf %25, %31 : vector<8x8xf32>
    %33 = math.exp %32 : vector<8x8xf32>
    %34 = arith.mulf %30, %16#1 : vector<8x1xf32>
    %cst_11 = arith.constant dense<0.000000e+00> : vector<8xf32>
    %35 = vector.multi_reduction <add>, %33, %cst_11 [1] : vector<8x8xf32> to vector<8xf32>
    %36 = vector.shape_cast %35 : vector<8xf32> to vector<8x1xf32>
    %37 = arith.addf %34, %36 : vector<8x1xf32>
    %38 = vector.broadcast %30 : vector<8x1xf32> to vector<8x8xf32>
    %39 = arith.mulf %38, %16#2 : vector<8x8xf32>
    %cst_12 = arith.constant dense<0.000000e+00> : vector<8x8xf32>
    %40 = tpu.matmul %33, %22, %cst_12 {dimension_numbers = #tpu.dot_dimension_numbers<[1], [0], [0], [1], [0, 0, 1, 1], [], []>} : vector<8x8xf32>, vector<8x8xf32>, vector<8x8xf32> -> vector<8x8xf32>
    %41 = arith.addf %39, %40 : vector<8x8xf32>
    %42 = tpu.reciprocal %37 {approx = true} : vector<8x1xf32> -> vector<8x1xf32>
    %43 = vector.broadcast %42 : vector<8x1xf32> to vector<8x8xf32>
    %44 = arith.mulf %41, %43 : vector<8x8xf32>
    %c0_13 = arith.constant 0 : index
    %c0_14 = arith.constant 0 : index
    %c0_15 = arith.constant 0 : index
    %45 = vector.load %arg4[%c0_13, %c0_14, %c0_15] : memref<4x8x32xf32, #tpu.memory_space<vmem>>, vector<1x8x32xf32>
    %46 = vector.shape_cast %45 : vector<1x8x32xf32> to vector<8x32xf32>
    %cst_16 = arith.constant dense<0.000000e+00> : vector<8x32xf32>
    %47 = tpu.matmul %44, %46, %cst_16 {dimension_numbers = #tpu.dot_dimension_numbers<[1], [0], [0], [1], [0, 0, 1, 1], [], []>} : vector<8x8xf32>, vector<8x32xf32>, vector<8x32xf32> -> vector<8x32xf32>
    %48 = arith.addf %8, %47 : vector<8x32xf32>
    %49 = arith.index_cast %4 : i32 to index
    %c8 = arith.constant 8 : index
    %50 = vector.load %arg7[%49, %c8] : memref<8x32xf32, #tpu.memory_space<vmem>>, vector<8x8xf32>
    %cst_17 = arith.constant -1.000000e+30 : f32
    %51 = vector.broadcast %cst_17 : f32 to vector<8x1xf32>
    %cst_18 = arith.constant 0.000000e+00 : f32
    %52 = vector.broadcast %cst_18 : f32 to vector<8x1xf32>
    %cst_19 = arith.constant 0.000000e+00 : f32
    %53 = vector.broadcast %cst_19 : f32 to vector<8x8xf32>
    %c0_i32_20 = arith.constant 0 : i32
    %54 = arith.subi %arg1, %c0_i32_20 : i32
    %55 = arith.addi %c0_i32_20, %54 : i32
    %c1_i32_21 = arith.constant 1 : i32
    %56:3 = scf.for %arg10 = %c0_i32_20 to %55 step %c1_i32_21 iter_args(%arg11 = %51, %arg12 = %52, %arg13 = %53) -> (vector<8x1xf32>, vector<8x1xf32>, vector<8x8xf32>)  : i32 {
      %c8_i32_70 = arith.constant 8 : i32
      %175 = arith.muli %arg10, %c8_i32_70 : i32
      %176 = tpu.assume_multiple %175, 8 : i32
      %177 = arith.index_cast %176 : i32 to index
      %c8_71 = arith.constant 8 : index
      %178 = vector.load %arg8[%177, %c8_71] : memref<8x32xf32, #tpu.memory_space<vmem>>, vector<8x8xf32>
      %179 = arith.index_cast %176 : i32 to index
      %c8_72 = arith.constant 8 : index
      %180 = vector.load %arg9[%179, %c8_72] : memref<8x32xf32, #tpu.memory_space<vmem>>, vector<8x8xf32>
      %cst_73 = arith.constant dense<0.000000e+00> : vector<8x8xf32>
      %181 = tpu.matmul %50, %178, %cst_73 {dimension_numbers = #tpu.dot_dimension_numbers<[1], [1], [0], [0], [0, 0, 1, 0], [], []>} : vector<8x8xf32>, vector<8x8xf32>, vector<8x8xf32> -> vector<8x8xf32>
      %cst_74 = arith.constant dense<0xFF800000> : vector<8xf32>
      %182 = vector.multi_reduction <maximumf>, %181, %cst_74 [1] : vector<8x8xf32> to vector<8xf32>
      %183 = vector.shape_cast %182 : vector<8xf32> to vector<8x1xf32>
      %184 = arith.maximumf %arg11, %183 : vector<8x1xf32>
      %185 = arith.subf %arg11, %184 : vector<8x1xf32>
      %186 = math.exp %185 : vector<8x1xf32>
      %187 = vector.broadcast %184 : vector<8x1xf32> to vector<8x8xf32>
      %188 = arith.subf %181, %187 : vector<8x8xf32>
      %189 = math.exp %188 : vector<8x8xf32>
      %190 = arith.mulf %186, %arg12 : vector<8x1xf32>
      %cst_75 = arith.constant dense<0.000000e+00> : vector<8xf32>
      %191 = vector.multi_reduction <add>, %189, %cst_75 [1] : vector<8x8xf32> to vector<8xf32>
      %192 = vector.shape_cast %191 : vector<8xf32> to vector<8x1xf32>
      %193 = arith.addf %190, %192 : vector<8x1xf32>
      %194 = vector.broadcast %186 : vector<8x1xf32> to vector<8x8xf32>
      %195 = arith.mulf %194, %arg13 : vector<8x8xf32>
      %cst_76 = arith.constant dense<0.000000e+00> : vector<8x8xf32>
      %196 = tpu.matmul %189, %180, %cst_76 {dimension_numbers = #tpu.dot_dimension_numbers<[1], [0], [0], [1], [0, 0, 1, 1], [], []>} : vector<8x8xf32>, vector<8x8xf32>, vector<8x8xf32> -> vector<8x8xf32>
      %197 = arith.addf %195, %196 : vector<8x8xf32>
      scf.yield %184, %193, %197 : vector<8x1xf32>, vector<8x1xf32>, vector<8x8xf32>
    }
    %c8_i32_22 = arith.constant 8 : i32
    %57 = arith.muli %arg1, %c8_i32_22 : i32
    %58 = tpu.assume_multiple %57, 8 : i32
    %59 = arith.index_cast %58 : i32 to index
    %c8_23 = arith.constant 8 : index
    %60 = vector.load %arg8[%59, %c8_23] : memref<8x32xf32, #tpu.memory_space<vmem>>, vector<8x8xf32>
    %61 = arith.index_cast %58 : i32 to index
    %c8_24 = arith.constant 8 : index
    %62 = vector.load %arg9[%61, %c8_24] : memref<8x32xf32, #tpu.memory_space<vmem>>, vector<8x8xf32>
    %cst_25 = arith.constant dense<0.000000e+00> : vector<8x8xf32>
    %63 = tpu.matmul %50, %60, %cst_25 {dimension_numbers = #tpu.dot_dimension_numbers<[1], [1], [0], [0], [0, 0, 1, 0], [], []>} : vector<8x8xf32>, vector<8x8xf32>, vector<8x8xf32> -> vector<8x8xf32>
    %cst_26 = arith.constant -1.000000e+30 : f32
    %64 = vector.broadcast %cst_26 : f32 to vector<8x8xf32>
    %65 = arith.select %7, %63, %64 : vector<8x8xi1>, vector<8x8xf32>
    %cst_27 = arith.constant dense<0xFF800000> : vector<8xf32>
    %66 = vector.multi_reduction <maximumf>, %65, %cst_27 [1] : vector<8x8xf32> to vector<8xf32>
    %67 = vector.shape_cast %66 : vector<8xf32> to vector<8x1xf32>
    %68 = arith.maximumf %56#0, %67 : vector<8x1xf32>
    %69 = arith.subf %56#0, %68 : vector<8x1xf32>
    %70 = math.exp %69 : vector<8x1xf32>
    %71 = vector.broadcast %68 : vector<8x1xf32> to vector<8x8xf32>
    %72 = arith.subf %65, %71 : vector<8x8xf32>
    %73 = math.exp %72 : vector<8x8xf32>
    %74 = arith.mulf %70, %56#1 : vector<8x1xf32>
    %cst_28 = arith.constant dense<0.000000e+00> : vector<8xf32>
    %75 = vector.multi_reduction <add>, %73, %cst_28 [1] : vector<8x8xf32> to vector<8xf32>
    %76 = vector.shape_cast %75 : vector<8xf32> to vector<8x1xf32>
    %77 = arith.addf %74, %76 : vector<8x1xf32>
    %78 = vector.broadcast %70 : vector<8x1xf32> to vector<8x8xf32>
    %79 = arith.mulf %78, %56#2 : vector<8x8xf32>
    %cst_29 = arith.constant dense<0.000000e+00> : vector<8x8xf32>
    %80 = tpu.matmul %73, %62, %cst_29 {dimension_numbers = #tpu.dot_dimension_numbers<[1], [0], [0], [1], [0, 0, 1, 1], [], []>} : vector<8x8xf32>, vector<8x8xf32>, vector<8x8xf32> -> vector<8x8xf32>
    %81 = arith.addf %79, %80 : vector<8x8xf32>
    %82 = tpu.reciprocal %77 {approx = true} : vector<8x1xf32> -> vector<8x1xf32>
    %83 = vector.broadcast %82 : vector<8x1xf32> to vector<8x8xf32>
    %84 = arith.mulf %81, %83 : vector<8x8xf32>
    %c1 = arith.constant 1 : index
    %c0_30 = arith.constant 0 : index
    %c0_31 = arith.constant 0 : index
    %85 = vector.load %arg4[%c1, %c0_30, %c0_31] : memref<4x8x32xf32, #tpu.memory_space<vmem>>, vector<1x8x32xf32>
    %86 = vector.shape_cast %85 : vector<1x8x32xf32> to vector<8x32xf32>
    %cst_32 = arith.constant dense<0.000000e+00> : vector<8x32xf32>
    %87 = tpu.matmul %84, %86, %cst_32 {dimension_numbers = #tpu.dot_dimension_numbers<[1], [0], [0], [1], [0, 0, 1, 1], [], []>} : vector<8x8xf32>, vector<8x32xf32>, vector<8x32xf32> -> vector<8x32xf32>
    %88 = arith.addf %48, %87 : vector<8x32xf32>
    %89 = arith.index_cast %4 : i32 to index
    %c16 = arith.constant 16 : index
    %90 = vector.load %arg7[%89, %c16] : memref<8x32xf32, #tpu.memory_space<vmem>>, vector<8x8xf32>
    %cst_33 = arith.constant -1.000000e+30 : f32
    %91 = vector.broadcast %cst_33 : f32 to vector<8x1xf32>
    %cst_34 = arith.constant 0.000000e+00 : f32
    %92 = vector.broadcast %cst_34 : f32 to vector<8x1xf32>
    %cst_35 = arith.constant 0.000000e+00 : f32
    %93 = vector.broadcast %cst_35 : f32 to vector<8x8xf32>
    %c0_i32_36 = arith.constant 0 : i32
    %94 = arith.subi %arg1, %c0_i32_36 : i32
    %95 = arith.addi %c0_i32_36, %94 : i32
    %c1_i32_37 = arith.constant 1 : i32
    %96:3 = scf.for %arg10 = %c0_i32_36 to %95 step %c1_i32_37 iter_args(%arg11 = %91, %arg12 = %92, %arg13 = %93) -> (vector<8x1xf32>, vector<8x1xf32>, vector<8x8xf32>)  : i32 {
      %c8_i32_70 = arith.constant 8 : i32
      %175 = arith.muli %arg10, %c8_i32_70 : i32
      %176 = tpu.assume_multiple %175, 8 : i32
      %177 = arith.index_cast %176 : i32 to index
      %c16_71 = arith.constant 16 : index
      %178 = vector.load %arg8[%177, %c16_71] : memref<8x32xf32, #tpu.memory_space<vmem>>, vector<8x8xf32>
      %179 = arith.index_cast %176 : i32 to index
      %c16_72 = arith.constant 16 : index
      %180 = vector.load %arg9[%179, %c16_72] : memref<8x32xf32, #tpu.memory_space<vmem>>, vector<8x8xf32>
      %cst_73 = arith.constant dense<0.000000e+00> : vector<8x8xf32>
      %181 = tpu.matmul %90, %178, %cst_73 {dimension_numbers = #tpu.dot_dimension_numbers<[1], [1], [0], [0], [0, 0, 1, 0], [], []>} : vector<8x8xf32>, vector<8x8xf32>, vector<8x8xf32> -> vector<8x8xf32>
      %cst_74 = arith.constant dense<0xFF800000> : vector<8xf32>
      %182 = vector.multi_reduction <maximumf>, %181, %cst_74 [1] : vector<8x8xf32> to vector<8xf32>
      %183 = vector.shape_cast %182 : vector<8xf32> to vector<8x1xf32>
      %184 = arith.maximumf %arg11, %183 : vector<8x1xf32>
      %185 = arith.subf %arg11, %184 : vector<8x1xf32>
      %186 = math.exp %185 : vector<8x1xf32>
      %187 = vector.broadcast %184 : vector<8x1xf32> to vector<8x8xf32>
      %188 = arith.subf %181, %187 : vector<8x8xf32>
      %189 = math.exp %188 : vector<8x8xf32>
      %190 = arith.mulf %186, %arg12 : vector<8x1xf32>
      %cst_75 = arith.constant dense<0.000000e+00> : vector<8xf32>
      %191 = vector.multi_reduction <add>, %189, %cst_75 [1] : vector<8x8xf32> to vector<8xf32>
      %192 = vector.shape_cast %191 : vector<8xf32> to vector<8x1xf32>
      %193 = arith.addf %190, %192 : vector<8x1xf32>
      %194 = vector.broadcast %186 : vector<8x1xf32> to vector<8x8xf32>
      %195 = arith.mulf %194, %arg13 : vector<8x8xf32>
      %cst_76 = arith.constant dense<0.000000e+00> : vector<8x8xf32>
      %196 = tpu.matmul %189, %180, %cst_76 {dimension_numbers = #tpu.dot_dimension_numbers<[1], [0], [0], [1], [0, 0, 1, 1], [], []>} : vector<8x8xf32>, vector<8x8xf32>, vector<8x8xf32> -> vector<8x8xf32>
      %197 = arith.addf %195, %196 : vector<8x8xf32>
      scf.yield %184, %193, %197 : vector<8x1xf32>, vector<8x1xf32>, vector<8x8xf32>
    }
    %c8_i32_38 = arith.constant 8 : i32
    %97 = arith.muli %arg1, %c8_i32_38 : i32
    %98 = tpu.assume_multiple %97, 8 : i32
    %99 = arith.index_cast %98 : i32 to index
    %c16_39 = arith.constant 16 : index
    %100 = vector.load %arg8[%99, %c16_39] : memref<8x32xf32, #tpu.memory_space<vmem>>, vector<8x8xf32>
    %101 = arith.index_cast %98 : i32 to index
    %c16_40 = arith.constant 16 : index
    %102 = vector.load %arg9[%101, %c16_40] : memref<8x32xf32, #tpu.memory_space<vmem>>, vector<8x8xf32>
    %cst_41 = arith.constant dense<0.000000e+00> : vector<8x8xf32>
    %103 = tpu.matmul %90, %100, %cst_41 {dimension_numbers = #tpu.dot_dimension_numbers<[1], [1], [0], [0], [0, 0, 1, 0], [], []>} : vector<8x8xf32>, vector<8x8xf32>, vector<8x8xf32> -> vector<8x8xf32>
    %cst_42 = arith.constant -1.000000e+30 : f32
    %104 = vector.broadcast %cst_42 : f32 to vector<8x8xf32>
    %105 = arith.select %7, %103, %104 : vector<8x8xi1>, vector<8x8xf32>
    %cst_43 = arith.constant dense<0xFF800000> : vector<8xf32>
    %106 = vector.multi_reduction <maximumf>, %105, %cst_43 [1] : vector<8x8xf32> to vector<8xf32>
    %107 = vector.shape_cast %106 : vector<8xf32> to vector<8x1xf32>
    %108 = arith.maximumf %96#0, %107 : vector<8x1xf32>
    %109 = arith.subf %96#0, %108 : vector<8x1xf32>
    %110 = math.exp %109 : vector<8x1xf32>
    %111 = vector.broadcast %108 : vector<8x1xf32> to vector<8x8xf32>
    %112 = arith.subf %105, %111 : vector<8x8xf32>
    %113 = math.exp %112 : vector<8x8xf32>
    %114 = arith.mulf %110, %96#1 : vector<8x1xf32>
    %cst_44 = arith.constant dense<0.000000e+00> : vector<8xf32>
    %115 = vector.multi_reduction <add>, %113, %cst_44 [1] : vector<8x8xf32> to vector<8xf32>
    %116 = vector.shape_cast %115 : vector<8xf32> to vector<8x1xf32>
    %117 = arith.addf %114, %116 : vector<8x1xf32>
    %118 = vector.broadcast %110 : vector<8x1xf32> to vector<8x8xf32>
    %119 = arith.mulf %118, %96#2 : vector<8x8xf32>
    %cst_45 = arith.constant dense<0.000000e+00> : vector<8x8xf32>
    %120 = tpu.matmul %113, %102, %cst_45 {dimension_numbers = #tpu.dot_dimension_numbers<[1], [0], [0], [1], [0, 0, 1, 1], [], []>} : vector<8x8xf32>, vector<8x8xf32>, vector<8x8xf32> -> vector<8x8xf32>
    %121 = arith.addf %119, %120 : vector<8x8xf32>
    %122 = tpu.reciprocal %117 {approx = true} : vector<8x1xf32> -> vector<8x1xf32>
    %123 = vector.broadcast %122 : vector<8x1xf32> to vector<8x8xf32>
    %124 = arith.mulf %121, %123 : vector<8x8xf32>
    %c2 = arith.constant 2 : index
    %c0_46 = arith.constant 0 : index
    %c0_47 = arith.constant 0 : index
    %125 = vector.load %arg4[%c2, %c0_46, %c0_47] : memref<4x8x32xf32, #tpu.memory_space<vmem>>, vector<1x8x32xf32>
    %126 = vector.shape_cast %125 : vector<1x8x32xf32> to vector<8x32xf32>
    %cst_48 = arith.constant dense<0.000000e+00> : vector<8x32xf32>
    %127 = tpu.matmul %124, %126, %cst_48 {dimension_numbers = #tpu.dot_dimension_numbers<[1], [0], [0], [1], [0, 0, 1, 1], [], []>} : vector<8x8xf32>, vector<8x32xf32>, vector<8x32xf32> -> vector<8x32xf32>
    %128 = arith.addf %88, %127 : vector<8x32xf32>
    %129 = arith.index_cast %4 : i32 to index
    %c24 = arith.constant 24 : index
    %130 = vector.load %arg7[%129, %c24] : memref<8x32xf32, #tpu.memory_space<vmem>>, vector<8x8xf32>
    %cst_49 = arith.constant -1.000000e+30 : f32
    %131 = vector.broadcast %cst_49 : f32 to vector<8x1xf32>
    %cst_50 = arith.constant 0.000000e+00 : f32
    %132 = vector.broadcast %cst_50 : f32 to vector<8x1xf32>
    %cst_51 = arith.constant 0.000000e+00 : f32
    %133 = vector.broadcast %cst_51 : f32 to vector<8x8xf32>
    %c0_i32_52 = arith.constant 0 : i32
    %134 = arith.subi %arg1, %c0_i32_52 : i32
    %135 = arith.addi %c0_i32_52, %134 : i32
    %c1_i32_53 = arith.constant 1 : i32
    %136:3 = scf.for %arg10 = %c0_i32_52 to %135 step %c1_i32_53 iter_args(%arg11 = %131, %arg12 = %132, %arg13 = %133) -> (vector<8x1xf32>, vector<8x1xf32>, vector<8x8xf32>)  : i32 {
      %c8_i32_70 = arith.constant 8 : i32
      %175 = arith.muli %arg10, %c8_i32_70 : i32
      %176 = tpu.assume_multiple %175, 8 : i32
      %177 = arith.index_cast %176 : i32 to index
      %c24_71 = arith.constant 24 : index
      %178 = vector.load %arg8[%177, %c24_71] : memref<8x32xf32, #tpu.memory_space<vmem>>, vector<8x8xf32>
      %179 = arith.index_cast %176 : i32 to index
      %c24_72 = arith.constant 24 : index
      %180 = vector.load %arg9[%179, %c24_72] : memref<8x32xf32, #tpu.memory_space<vmem>>, vector<8x8xf32>
      %cst_73 = arith.constant dense<0.000000e+00> : vector<8x8xf32>
      %181 = tpu.matmul %130, %178, %cst_73 {dimension_numbers = #tpu.dot_dimension_numbers<[1], [1], [0], [0], [0, 0, 1, 0], [], []>} : vector<8x8xf32>, vector<8x8xf32>, vector<8x8xf32> -> vector<8x8xf32>
      %cst_74 = arith.constant dense<0xFF800000> : vector<8xf32>
      %182 = vector.multi_reduction <maximumf>, %181, %cst_74 [1] : vector<8x8xf32> to vector<8xf32>
      %183 = vector.shape_cast %182 : vector<8xf32> to vector<8x1xf32>
      %184 = arith.maximumf %arg11, %183 : vector<8x1xf32>
      %185 = arith.subf %arg11, %184 : vector<8x1xf32>
      %186 = math.exp %185 : vector<8x1xf32>
      %187 = vector.broadcast %184 : vector<8x1xf32> to vector<8x8xf32>
      %188 = arith.subf %181, %187 : vector<8x8xf32>
      %189 = math.exp %188 : vector<8x8xf32>
      %190 = arith.mulf %186, %arg12 : vector<8x1xf32>
      %cst_75 = arith.constant dense<0.000000e+00> : vector<8xf32>
      %191 = vector.multi_reduction <add>, %189, %cst_75 [1] : vector<8x8xf32> to vector<8xf32>
      %192 = vector.shape_cast %191 : vector<8xf32> to vector<8x1xf32>
      %193 = arith.addf %190, %192 : vector<8x1xf32>
      %194 = vector.broadcast %186 : vector<8x1xf32> to vector<8x8xf32>
      %195 = arith.mulf %194, %arg13 : vector<8x8xf32>
      %cst_76 = arith.constant dense<0.000000e+00> : vector<8x8xf32>
      %196 = tpu.matmul %189, %180, %cst_76 {dimension_numbers = #tpu.dot_dimension_numbers<[1], [0], [0], [1], [0, 0, 1, 1], [], []>} : vector<8x8xf32>, vector<8x8xf32>, vector<8x8xf32> -> vector<8x8xf32>
      %197 = arith.addf %195, %196 : vector<8x8xf32>
      scf.yield %184, %193, %197 : vector<8x1xf32>, vector<8x1xf32>, vector<8x8xf32>
    }
    %c8_i32_54 = arith.constant 8 : i32
    %137 = arith.muli %arg1, %c8_i32_54 : i32
    %138 = tpu.assume_multiple %137, 8 : i32
    %139 = arith.index_cast %138 : i32 to index
    %c24_55 = arith.constant 24 : index
    %140 = vector.load %arg8[%139, %c24_55] : memref<8x32xf32, #tpu.memory_space<vmem>>, vector<8x8xf32>
    %141 = arith.index_cast %138 : i32 to index
    %c24_56 = arith.constant 24 : index
    %142 = vector.load %arg9[%141, %c24_56] : memref<8x32xf32, #tpu.memory_space<vmem>>, vector<8x8xf32>
    %cst_57 = arith.constant dense<0.000000e+00> : vector<8x8xf32>
    %143 = tpu.matmul %130, %140, %cst_57 {dimension_numbers = #tpu.dot_dimension_numbers<[1], [1], [0], [0], [0, 0, 1, 0], [], []>} : vector<8x8xf32>, vector<8x8xf32>, vector<8x8xf32> -> vector<8x8xf32>
    %cst_58 = arith.constant -1.000000e+30 : f32
    %144 = vector.broadcast %cst_58 : f32 to vector<8x8xf32>
    %145 = arith.select %7, %143, %144 : vector<8x8xi1>, vector<8x8xf32>
    %cst_59 = arith.constant dense<0xFF800000> : vector<8xf32>
    %146 = vector.multi_reduction <maximumf>, %145, %cst_59 [1] : vector<8x8xf32> to vector<8xf32>
    %147 = vector.shape_cast %146 : vector<8xf32> to vector<8x1xf32>
    %148 = arith.maximumf %136#0, %147 : vector<8x1xf32>
    %149 = arith.subf %136#0, %148 : vector<8x1xf32>
    %150 = math.exp %149 : vector<8x1xf32>
    %151 = vector.broadcast %148 : vector<8x1xf32> to vector<8x8xf32>
    %152 = arith.subf %145, %151 : vector<8x8xf32>
    %153 = math.exp %152 : vector<8x8xf32>
    %154 = arith.mulf %150, %136#1 : vector<8x1xf32>
    %cst_60 = arith.constant dense<0.000000e+00> : vector<8xf32>
    %155 = vector.multi_reduction <add>, %153, %cst_60 [1] : vector<8x8xf32> to vector<8xf32>
    %156 = vector.shape_cast %155 : vector<8xf32> to vector<8x1xf32>
    %157 = arith.addf %154, %156 : vector<8x1xf32>
    %158 = vector.broadcast %150 : vector<8x1xf32> to vector<8x8xf32>
    %159 = arith.mulf %158, %136#2 : vector<8x8xf32>
    %cst_61 = arith.constant dense<0.000000e+00> : vector<8x8xf32>
    %160 = tpu.matmul %153, %142, %cst_61 {dimension_numbers = #tpu.dot_dimension_numbers<[1], [0], [0], [1], [0, 0, 1, 1], [], []>} : vector<8x8xf32>, vector<8x8xf32>, vector<8x8xf32> -> vector<8x8xf32>
    %161 = arith.addf %159, %160 : vector<8x8xf32>
    %162 = tpu.reciprocal %157 {approx = true} : vector<8x1xf32> -> vector<8x1xf32>
    %163 = vector.broadcast %162 : vector<8x1xf32> to vector<8x8xf32>
    %164 = arith.mulf %161, %163 : vector<8x8xf32>
    %c3 = arith.constant 3 : index
    %c0_62 = arith.constant 0 : index
    %c0_63 = arith.constant 0 : index
    %165 = vector.load %arg4[%c3, %c0_62, %c0_63] : memref<4x8x32xf32, #tpu.memory_space<vmem>>, vector<1x8x32xf32>
    %166 = vector.shape_cast %165 : vector<1x8x32xf32> to vector<8x32xf32>
    %cst_64 = arith.constant dense<0.000000e+00> : vector<8x32xf32>
    %167 = tpu.matmul %164, %166, %cst_64 {dimension_numbers = #tpu.dot_dimension_numbers<[1], [0], [0], [1], [0, 0, 1, 1], [], []>} : vector<8x8xf32>, vector<8x32xf32>, vector<8x32xf32> -> vector<8x32xf32>
    %168 = arith.addf %128, %167 : vector<8x32xf32>
    %c0_65 = arith.constant 0 : index
    %c0_66 = arith.constant 0 : index
    %169 = vector.load %arg5[%c0_65, %c0_66] : memref<1x32xf32, #tpu.memory_space<vmem>>, vector<1x32xf32>
    %170 = vector.broadcast %169 : vector<1x32xf32> to vector<8x32xf32>
    %171 = arith.addf %168, %170 : vector<8x32xf32>
    %c0_67 = arith.constant 0 : index
    %c0_68 = arith.constant 0 : index
    %c0_69 = arith.constant 0 : index
    %172 = vector.load %arg6[%c0_67, %c0_68, %c0_69] : memref<1x8x32xf32, #tpu.memory_space<vmem>>, vector<1x8x32xf32>
    %173 = vector.shape_cast %172 : vector<1x8x32xf32> to vector<8x32xf32>
    %174 = vector.shape_cast %171 : vector<8x32xf32> to vector<1x8x32xf32>
    tpu.vector_store %arg6[%c0_67, %c0_68, %c0_69], %174 {strides = array<i32>} : memref<1x8x32xf32, #tpu.memory_space<vmem>>, vector<1x8x32xf32>,
    return
  }
  func.func @transform_0(%arg0: i32, %arg1: i32) -> (i32, i32, i32) {
    %c0_i32 = arith.constant 0 : i32
    %c0_i32_0 = arith.constant 0 : i32
    %c0_i32_1 = arith.constant 0 : i32
    return %arg0, %c0_i32, %c0_i32_0 : i32, i32, i32
  }
  func.func @transform_1(%arg0: i32, %arg1: i32) -> (i32, i32, i32) {
    %c0_i32 = arith.constant 0 : i32
    %c0_i32_0 = arith.constant 0 : i32
    %c0_i32_1 = arith.constant 0 : i32
    %c0_i32_2 = arith.constant 0 : i32
    return %c0_i32, %c0_i32_0, %c0_i32_1 : i32, i32, i32
  }
  func.func @transform_2(%arg0: i32, %arg1: i32) -> (i32, i32, i32) {
    %c0_i32 = arith.constant 0 : i32
    %c0_i32_0 = arith.constant 0 : i32
    %c0_i32_1 = arith.constant 0 : i32
    %c0_i32_2 = arith.constant 0 : i32
    return %c0_i32, %c0_i32_0, %c0_i32_1 : i32, i32, i32
  }
  func.func @transform_3(%arg0: i32, %arg1: i32) -> (i32, i32) {
    %c0_i32 = arith.constant 0 : i32
    %c0_i32_0 = arith.constant 0 : i32
    %c0_i32_1 = arith.constant 0 : i32
    return %c0_i32, %c0_i32_0 : i32, i32
  }
  func.func @transform_4(%arg0: i32, %arg1: i32) -> (i32, i32, i32) {
    %c0_i32 = arith.constant 0 : i32
    %c0_i32_0 = arith.constant 0 : i32
    return %arg0, %arg1, %c0_i32 : i32, i32, i32
  }
}

</mosaic_0001>

<bundles_post_ra>
// kernel: tpu_custom_call.1
= control target key start
LH: loop header
LB: loop body
LE: loop exit
PB: predicated region body
PF: predicated region fallthrough
CT: control target
= control target key end

     0   :  { %9 = vsyncpa [#allocation6], 0  ;;  %s1890_s0 = inlined_call_operand.hbm [shape: f32[2,8,32], index: 0, kind: input, shape index: {}]   ;;  %s1891_s1 = inlined_call_operand.hbm [shape: f32[3,32,32], index: 1, kind: input, shape index: {}]   ;;  %s1892_s2 = inlined_call_operand.hbm [shape: f32[4,8,32], index: 2, kind: input, shape index: {}]   ;;  %s1893_s3 = inlined_call_operand.vmem [shape: f32[1,32], index: 3, kind: input, shape index: {}]   ;;  %s1894_s4 = inlined_call_operand.hbm [shape: f32[2,8,32], index: 4, kind: output, shape index: {}]  }
   0x1   :  { %11 = vsyncpa [#allocation6 + $0x1], 0 }
   0x2   :  { %12 = vsyncpa [#allocation9], 0 }
   0x3   :  { %13 = vsyncpa [#allocation7], 0 }
   0x4   :  { %15 = vsyncpa [#allocation7 + $0x1], 0  ;;  %s1672_s15 = smov 0   ;;  %s1674_s16 = smov 0  }
   0x5   :  { %s1676_s17 = smov 0   ;;  %s1678_s18 = smov 0  }
   0x6   :  { %s1680_s19 = smov 0   ;;  %s1682_s20 = smov 0  }
   0x7 LB: > { %s1297_s21 = sadd.s32 4294967295, %s1638_s20   ;;  %p1299_p0 = scmp.ge.s32.totalorder %s1638_s20, 1  ;;  %s1638_s20 = sphi %s1682_s20, %s21_s20   ;;  %s1634_s19 = sphi %s1680_s19, %s1904_s19   ;;  %s1630_s18 = sphi %s1678_s18, %s1903_s18   ;;  %s1626_s17 = sphi %s1676_s17, %s1902_s17   ;;  %s1622_s16 = sphi %s1674_s16, %s1901_s16   ;;  %s1618_s15 = sphi %s1672_s15, %s1900_s15  }
   0x8   : > { %p1706_p1 = scmp.eq.s32.totalorder %s1297_s21, 0  ;;  %p155_p2 = scmp.lt.s32.totalorder %s1638_s20, 3 }
   0x9   : > { %s166_s25 = sshll.u32 %s1891_s1, 4  ;;  %s1640_s27 = smov [#allocation8]   ;;  %s167_s25 = int_to_ptr.hbm [resolvable:$true] %s166_s25 }
   0xa   : > { %p1714_p3 = pnand %p1299_p0, %p155_p2  ;;  %s168_s28 = sshll.u32 %s1640_s27, 4  ;;  %s169_s28 = int_to_ptr.vmem [resolvable:$true] %s168_s28 }
   0xb   : > { %p1302_p6 = scmp.ge.s32.totalorder %s1638_s20, 2  ;;  %s180_s5 = sshll.u32 %s1892_s2, 4  ;;  %s181_s5 = int_to_ptr.hbm [resolvable:$true] %s180_s5 }
   0xc   : > { %p1361_p4 = pneg %p1714_p3  ;;  %s1641_s6 = smov 128  }
   0xd   : > { %s1642_s7 = smov 8   ;;  %s1643_s8 = smov [#allocation10]  }
   0xe   : > { %p1362_p5 = pnand %p1361_p4, %p1706_p1  ;;  %s182_s9 = sshll.u32 %s1643_s8, 4  ;;  %s183_s9 = int_to_ptr.vmem [resolvable:$true] %s182_s9 }
   0xf   : > { %s33_s10 = sadd.s32 1, %s1634_s19  ;;  %s1298_s11 = sadd.s32 4294967294, %s1638_s20  }
  0x10   : > { %1364 = dma.hbm_to_vmem [thread:$0]  (!%p1362_p5), %s167_s25, 1536, %s169_s28, [#allocation9], %s1641_s6, %s1641_s6, %s1642_s7  }
  0x11   : > { %1367 = dma.hbm_to_vmem [thread:$0]  (!%p1362_p5), %s181_s5, 512, %s183_s9, [#allocation9], %s1641_s6, %s1641_s6, %s1642_s7  }
  0x12   : > { %p35_p7 = scmp.ge.s32.totalorder %s33_s10, 2  ;;  %s40_s12 = sadd.s32 1, %s1626_s17 }
  0x13   : > { %p47_p8 = scmp.ne.s32.totalorder %s1626_s17, %s1622_s16  ;;  %p48_p9 = scmp.eq.s32.totalorder %s1638_s20, 0 }
  0x14   : > { %s1906_s10 = smov (%p35_p7, %s33_s10), 0  ;;  %p53_p10 = scmp.ne.s32.totalorder %s1622_s16, %s1618_s15 }
  0x15   : > { %s37_s13 = ssub.s32 %s1634_s19, %s1906_s10  ;;  %p142_p11 = scmp.eq.s32.totalorder %s1297_s21, 1 }
  0x16   : > { %p38_p12 = scmp.eq.s32.totalorder %s37_s13, 0  ;;  %p1742_p13 = por %p1706_p1, %p53_p10 }
  0x17   : > { %p1746_p0 = por %p142_p11, %p47_p8  ;;  %p148_p2 = scmp.eq.s32.totalorder %s1298_s11, 1 }
  0x18   : > { %s1751_s24 = scalar_select %p38_p12, %s1626_s17, %s40_s12  }
  0x19   : > { %p49_p4 = por %p48_p9, %p47_p8  ;;  %p1753_p5 = por %p148_p2, %p53_p10 }
  0x1a   : > { %s199_s27 = sand.u32 1, %s1626_s17   ;;  %s1304_s21 = sshll.u32 %s1634_s19, 3 }
  0x1b   : > { %p1378_p7 = scmp.lt.s32.totalorder %s1638_s20, 2  ;;  %s1303_s28 = sshll.u32 %s199_s27, 3 }
  0x1c   : > { %s207_s5 = scalar_lea.hbm %s1890_s0, %s1304_s21  ;;  %s203_s7 = scalar_lea.vmem [#allocation5], %s1303_s28 }
  0x1d   : > { %s209_s6 = sshll.u32 %s207_s5, 4  ;;  %s211_s8 = sshll.u32 %s203_s7, 4  ;;  %s210_s6 = int_to_ptr.hbm [resolvable:$true] %s209_s6  ;;  %s212_s8 = int_to_ptr.vmem [resolvable:$true] %s211_s8 }
  0x1e   : > { %p1369_p11 = pnand %p1378_p7, %p49_p4  ;;  %s200_s9 = scalar_lea.sflag [#allocation6], %s199_s27 }
  0x1f   : > { %220 = sbr.rel (%p1714_p3) target bundleno = 1118 (0x45e), region = 36  ;;  %s1766_s11 = sand.u32 (!%p1714_p3), 1, %s1622_s16  }
  0x20   : > { %1371 = dma.hbm_to_vmem [thread:$0]  (!%p1369_p11), %s210_s6, 128, %s212_s8, %s200_s9  }
  0x21   : > { %s1306_s12 = sshll.u32 (!%p1714_p3), %s1766_s11, 3  ;;  %s223_s13 = scalar_lea.sflag (!%p1714_p3), [#allocation6], %s1766_s11 }
  0x22   : > { %s226_s21 = scalar_lea.vmem (!%p1714_p3), [#allocation5], %s1306_s12 }
  0x24   : > { %1605 = dma.done.wait (%p1742_p13), %s223_s13, 128  }
  0x25   : > { %1607 = vsyncadd (%p1742_p13), %s223_s13, 4294967168 }
  0x26   : > { %1609 = dma.done.wait (%p1706_p1), [#allocation9], 2048  }
  0x27   : > { %1611 = vsyncadd (%p1706_p1), [#allocation9], 4294965248  ;;  %v301_v0 = vld [vmem:[#allocation8 + $0x38] sm:$0xff]  ;;  %v300_v2 = vld [vmem:[#allocation8 + $0x30] sm:$0xff]  ;;  %vm271_vm0 = vcmask 261120   ;;  %vm442_vm1 = vcmask 64512   ;;  %v350_v21 = vlaneseq }
  0x28   : > { %v270_v1 = vld [vmem:[#allocation8 + $0x18] sm:$0xff]  ;;  %314 = vmatpush.msra.mxu1 %v301_v0  ;;  %v269_v3 = vld [vmem:[#allocation8 + $0x10] sm:$0xff]  ;;  %v299_v4 = vld [vmem:[#allocation8 + $0x28] sm:$0xff]  ;;  %s1644_s22 = smov 112   ;;  %s1645_s26 = smov 120  }
  0x29   : > { %287 = vmatpush.msra.mxu0 %v270_v1  ;;  %v268_v5 = vld [vmem:[#allocation8 + $0x8] sm:$0xff]  ;;  %v298_v6 = vld [vmem:[#allocation8 + $0x20] sm:$0xff]  ;;  %v266_v8 = vld [vmem:[%s226_s21] sm:$0xff]  ;;  %s1646_s14 = smov 104   ;;  %v1795_v22 = vshrl.u32 %v350_v21, 7  ;;  %v1797_v23 = vand.u32 127, %v350_v21 }
  0x2a   : > { %315 = vmatpush.msra.mxu1 %v300_v2  ;;  %v267_v7 = vld [vmem:[#allocation8] sm:$0xff]  ;;  %v327_v14 = vld [vmem:[#allocation8 + $0x58] sm:$0xff]  ;;  %v326_v15 = vld [vmem:[#allocation8 + $0x50] sm:$0xff]  ;;  %s1346_s27 = sshll.u32 %s1630_s18, 3  ;;  %s261_s7 = scalar_lea.vmem [#allocation11], %s1306_s12 }
  0x2b   : > { %288 = vmatpush.msra.mxu0 %v269_v3  ;;  %340 = vmatpush.msra.mxu2 %v327_v14  ;;  %v325_v16 = vld [vmem:[#allocation8 + $0x48] sm:$0xff]  ;;  %v324_v17 = vld [vmem:[#allocation8 + $0x40] sm:$0xff]  ;;  %vm354_vm2 = vcmp.le.s32.totalorder %v1797_v23, %v1795_v22  ;;  %s1116_s30 = scalar_lea.hbm %s1894_s4, %s1346_s27  ;;  %s1118_s8 = sshll.u32 %s261_s7, 4  ;;  %s1119_s8 = int_to_ptr.vmem [resolvable:$true] %s1118_s8 }
  0x2c   : > { %316 = vmatpush.msra.mxu1 %v299_v4  ;;  %v512_v28 = vld [vmem:[#allocation10] sm:$0xff]  ;;  %v676_v60 = vld [vmem:[#allocation10 + $0x8] sm:$0xff]  ;;  %s1120_s9 = sshll.u32 %s1116_s30, 4  ;;  %s1105_s18 = scalar_lea.sflag [#allocation7], %s1766_s11  ;;  %s1121_s9 = int_to_ptr.hbm [resolvable:$true] %s1120_s9 }
  0x2d   : > { %289 = vmatpush.msra.mxu0 %v268_v5  ;;  %341 = vmatpush.msra.mxu2 %v326_v15  ;;  %s1566_s13 = sshra.s32 %s1121_s9, 4  ;;  %s1572_s12 = scalar_lea.hbm %s1894_s4, 16  ;;  %s1567_s13 = int_to_ptr.hbm [resolvable:$true] %s1566_s13 }
  0x2e   : > { %317 = vmatpush.msra.mxu1 %v298_v6  ;;  %s1568_s21 = scalar_lea.hbm %s1567_s13, 8  ;;  %p1573_p9 = scmp.lt.s32.totalorder %s1567_s13, %s1894_s4 }
  0x2f   : > { %290 = vmatpush.msra.mxu0 %v267_v7  ;;  %1311 = vmatmul.msk.f32.vlgmr.msra.gmra.mxu1 %vm271_vm0, %v266_v8  ;;  %p1569_p1 = scmp.ne.s32.totalorder %s1567_s13, %s1568_s21  ;;  %p1574_p10 = scmp.lt.s32.totalorder %s1572_s12, %s1568_s21 }
  0x30   : > { %1310 = vmatmul.msk.f32.vlgmr.msra.gmra.mxu0 %vm271_vm0, %v266_v8  ;;  %342 = vmatpush.msra.mxu2 %v325_v16 }
  0x31   : > { %p1570_p3 = pnand %p1569_p1, %p1746_p0  ;;  %p1575_p12 = por %p1574_p10, %p1573_p9 }
  0x32   : > { %343 = vmatpush.msra.mxu2 %v324_v17 }
  0x33   : > { %1312 = vmatmul.msk.f32.vlgmr.msra.gmra.mxu2 %vm271_vm0, %v266_v8  ;;  %p1571_p8 = pneg %p1570_p3 }
  0x34   : > { %695 = vmatpush.msrb.mxu2 %v676_v60 }
  0x35   : > { %p1576_p13 = pnand %p1575_p12, %p1571_p8 }
  0xac   : > { %v319_v9 = vpop.f32.mrf.mxu1 }
  0xad   : > { %v292_v10 = vpop.f32.mrf.mxu0  ;;  %322 = vst.msk [vmem:[#allocation3] sm:$0xff] %vm271_vm0, %v319_v9 }
  0xae   : > { %v295_v11 = vmul.f32 0.35355338, %v292_v10 }
  0xb0   : > { %296 = vst.msk [vmem:[#allocation2] sm:$0xff] %vm271_vm0, %v295_v11 }
  0xb4   : > { %v439_v12 = vld [vmem:[#allocation3] sm:$0xff] }
  0xb5   : > { %812 = vrot.lane.b32.xlu2 %v439_v12, %s1644_s22  ;;  %602 = vrot.lane.b32.xlu1 %v439_v12, %s1645_s26 }
  0xb6   : > { %1317 = vmatpush.xpose.msk.msra.mxu3 %vm442_vm1, %v439_v12  ;;  %v345_v27 = vpop.f32.mrf.mxu2 }
  0xb7   : > { %v356_v13 = vld [vmem:[#allocation2] sm:$0xff]  ;;  %348 = vst.msk [vmem:[#allocation4] sm:$0xff] %vm271_vm0, %v345_v27  ;;  %v885_v27 = vld [vmem:[#allocation10 + $0x10] sm:$0xff] }
  0xb8   : > { %904 = vmatpush.msra.mxu2 %v885_v27 }
  0xb9   : > { %1318 = vmatmul.msk.f32.vlgmr.msra.gmra.mxu3 %vm442_vm1, %v356_v13 }
  0xbd   : > { %999 = vrot.lane.b32.xlu2 %v439_v12, %s1646_s14  ;;  %600 = vrot.lane.b32.xlu1 %v356_v13, %s1645_s26 }
  0xbe   : > { %v1806_v29 = vld [vmem:[#allocation4] sm:$0xff] }
  0xbf   : > { %504 = vmatpush.msrb.mxu3 %v1806_v29 }
  0xc1   : > { %718 = vmatpush.msra.mxu3 %v512_v28 }
  0xc5   : > { %997 = vrot.lane.b32.xlu1 %v356_v13, %s1646_s14 }
 0x10f   : > { %v813_v19 = vpop.permute.xlu2 %812 }
 0x117   : > { %v1000_v38 = vpop.permute.xlu2 %999 }
 0x127   : > { %v603_v18 = vpop.permute.xlu1 %602 }
 0x128   : > { %1324 = vmatpush.xpose.msk.msrb.mxu0 %vm442_vm1, %v603_v18 }
 0x12c   : > { %1333 = vmatpush.xpose.msk.msra.mxu0 %vm442_vm1, %v813_v19 }
 0x12f   : > { %v601_v20 = vpop.permute.xlu1 %600 }
 0x130   : > { %1325 = vmatmul.msk.f32.vlgmr.msrb.gmra.mxu0 %vm442_vm1, %v601_v20 }
 0x137   : > { %v998_v57 = vpop.permute.xlu1 %997 }
 0x13c   : > { %v466_v24 = vpop.f32.mrf.mxu3 }
 0x13d   : > { %v469_v25 = vsel %vm354_vm2, %v466_v24, -1e+30 }
 0x13e   : > { %v470_v26 = vsel %vm442_vm1, %v469_v25, -inf }
 0x13f   : > { %471 = vmax.xlane.f32.xlu0 %v470_v26 }
 0x1ad   : > { %v625_v30 = vpop.f32.mrf.mxu0 }
 0x1ae   : > { %v628_v31 = vsel %vm354_vm2, %v625_v30, -1e+30  ;;  %v1072_v30 = vld [vmem:[#allocation10 + $0x18] sm:$0xff] }
 0x1af   : > { %v629_v32 = vsel %vm442_vm1, %v628_v31, -inf }
 0x1b0   : > { %630 = vmax.xlane.f32.xlu2 %v629_v32 }
 0x1b2   : > { %v472_v33 = vpop.xlane.xlu0 %471 }
 0x1b3   : > { %v473_v34 = vmax.f32 %v472_v33, -1e+30 }
 0x1b5   : > { %v477_v35 = vsub.f32 %v469_v25, %v473_v34  ;;  %v474_v44 = vsub.f32 -1e+30, %v473_v34 }
 0x1b7   : > { %v478_v36 = vmul.f32 1.442695, %v477_v35  ;;  %v475_v45 = vmul.f32 1.442695, %v474_v44 }
 0x1b9   : > { %1438 = vpow2.f32 %v478_v36 }
 0x1bf   : > { %v1439_v37 = vpop.eup %1438 }
 0x1c0   : > { %1319 = vmatmul.msk.f32.vlgmr.msrb.gmra.mxu3 %vm442_vm1, %v1439_v37  ;;  %v481_v39 = vsel %vm442_vm1, %v1439_v37, 0.0 }
 0x1c1   : > { %1341 = vmatpush.xpose.msk.msrb.mxu3 %vm442_vm1, %v1000_v38  ;;  %482 = vadd.xlane.f32.xlu0 %v481_v39 }
 0x1c8   : > { %855 = vrot.lane.b32.xlu2 %v1806_v29, %s1644_s22 }
 0x1d5   : > { %810 = vrot.lane.b32.xlu0 %v356_v13, %s1644_s22 }
 0x1dd   : > { %646 = vrot.lane.b32.xlu0 %v1806_v29, %s1645_s26 }
 0x223   : > { %v631_v40 = vpop.xlane.xlu2 %630 }
 0x224   : > { %v632_v41 = vmax.f32 %v631_v40, -1e+30 }
 0x226   : > { %v636_v42 = vsub.f32 %v628_v31, %v632_v41  ;;  %v633_v61 = vsub.f32 -1e+30, %v632_v41 }
 0x228   : > { %v637_v43 = vmul.f32 1.442695, %v636_v42  ;;  %v634_v62 = vmul.f32 1.442695, %v633_v61 }
 0x22a   : > { %1440 = vpow2.f32 %v637_v43 }
 0x22b   : > { %1442 = vpow2.f32 %v475_v45  ;;  %v856_v59 = vpop.permute.xlu2 %855 }
 0x230   : > { %v1441_v46 = vpop.eup %1440 }
 0x231   : > { %v640_v47 = vsel %vm442_vm1, %v1441_v46, 0.0  ;;  %v1443_v48 = vpop.eup %1442 }
 0x232   : > { %641 = vadd.xlane.f32.xlu2 %v640_v47  ;;  %v480_v50 = vmul.f32 0.0, %v1443_v48 }
 0x234   : > { %v483_v49 = vpop.xlane.xlu0 %482 }
 0x235   : > { %v484_v51 = vadd.f32 %v483_v49, %v480_v50 }
 0x237   : > { %1444 = vrcp.f32 %v484_v51 }
 0x238   : > { %1446 = vpow2.f32 %v634_v62 }
 0x23d   : > { %v1445_v54 = vpop.eup %1444 }
 0x23e   : > { %v1447_v63 = vpop.eup %1446 }
 0x23f   : > { %v639_v1 = vmul.f32 0.0, %v1447_v63 }
 0x243   : > { %v506_v52 = vpop.f32.mrf.mxu3 }
 0x244   : > { %v509_v53 = vadd.f32 %v506_v52, %v480_v50 }
 0x246   : > { %v511_v55 = vmul.f32 %v1445_v54, %v509_v53  ;;  %v1437_v53 = vld [vmem:[%s1893_s3] ss:$0 sm:$0xff] }
 0x247   : > { %v811_v56 = vpop.permute.xlu0 %810 }
 0x248   : > { %1328 = vmatmul.msk.f32.vlgmr.msra.gmra.mxu3 %vm442_vm1, %v511_v55  ;;  %1334 = vmatmul.msk.f32.vlgmr.msra.gmra.mxu0 %vm442_vm1, %v811_v56 }
 0x24f   : > { %v647_v58 = vpop.permute.xlu0 %646 }
 0x250   : > { %667 = vmatpush.msrb.mxu1 %v647_v58  ;;  %1342 = vmatmul.msk.f32.vlgmr.msrb.gmra.mxu3 %vm442_vm1, %v998_v57 }
 0x251   : > { %1326 = vmatmul.msk.f32.vlgmr.msrb.gmra.mxu1 %vm442_vm1, %v1441_v46 }
 0x252   : > { %876 = vmatpush.msra.mxu1 %v856_v59 }
 0x254   : > { %1091 = vmatpush.msrb.mxu1 %v1072_v30 }
 0x2a5   : > { %v642_v0 = vpop.xlane.xlu2 %641 }
 0x2a6   : > { %v643_v3 = vadd.f32 %v642_v0, %v639_v1 }
 0x2a8   : > { %1448 = vrcp.f32 %v643_v3 }
 0x2ae   : > { %v1449_v9 = vpop.eup %1448 }
 0x2c5   : > { %v835_v2 = vpop.f32.mrf.mxu0 }
 0x2c6   : > { %v838_v4 = vsel %vm354_vm2, %v835_v2, -1e+30 }
 0x2c7   : > { %v839_v5 = vsel %vm442_vm1, %v838_v4, -inf }
 0x2c8   : > { %840 = vmax.xlane.f32.xlu1 %v839_v5 }
 0x2cb   : > { %v1830_v6 = vpop.f32.mrf.mxu3 }
 0x2ce   : > { %v669_v7 = vpop.f32.mrf.mxu1 }
 0x2cf   : > { %v672_v8 = vadd.f32 %v669_v7, %v639_v1 }
 0x2d1   : > { %v674_v10 = vmul.f32 %v1449_v9, %v672_v8 }
 0x2d3   : > { %1327 = vmatmul.msk.f32.vlgmr.msrb.gmra.mxu2 %vm442_vm1, %v674_v10  ;;  %v1022_v11 = vpop.f32.mrf.mxu3 }
 0x2d4   : > { %v1025_v12 = vsel %vm354_vm2, %v1022_v11, -1e+30 }
 0x2d5   : > { %v1026_v13 = vsel %vm442_vm1, %v1025_v12, -inf }
 0x2d6   : > { %1027 = vmax.xlane.f32.xlu0 %v1026_v13 }
 0x2e1   : > { %1042 = vrot.lane.b32.xlu1 %v1806_v29, %s1646_s14 }
 0x33b   : > { %v841_v14 = vpop.xlane.xlu1 %840 }
 0x33c   : > { %v842_v15 = vmax.f32 %v841_v14, -1e+30 }
 0x33e   : > { %v846_v16 = vsub.f32 %v838_v4, %v842_v15  ;;  %v843_v28 = vsub.f32 -1e+30, %v842_v15 }
 0x340   : > { %v847_v17 = vmul.f32 1.442695, %v846_v16  ;;  %v844_v29 = vmul.f32 1.442695, %v843_v28 }
 0x342   : > { %1450 = vpow2.f32 %v847_v17 }
 0x348   : > { %v1451_v18 = vpop.eup %1450 }
 0x349   : > { %v1028_v19 = vpop.xlane.xlu0 %1027  ;;  %1335 = vmatmul.msk.f32.vlgmr.msra.gmra.mxu1 %vm442_vm1, %v1451_v18  ;;  %v850_v21 = vsel %vm442_vm1, %v1451_v18, 0.0 }
 0x34a   : > { %v1029_v20 = vmax.f32 %v1028_v19, -1e+30  ;;  %851 = vadd.xlane.f32.xlu0 %v850_v21 }
 0x34c   : > { %v1033_v22 = vsub.f32 %v1025_v12, %v1029_v20  ;;  %v1030_v32 = vsub.f32 -1e+30, %v1029_v20 }
 0x34e   : > { %v1034_v23 = vmul.f32 1.442695, %v1033_v22  ;;  %v1031_v34 = vmul.f32 1.442695, %v1030_v32 }
 0x350   : > { %1452 = vpow2.f32 %v1034_v23 }
 0x351   : > { %1454 = vpow2.f32 %v844_v29 }
 0x352   : > { %1456 = vpow2.f32 %v1031_v34 }
 0x353   : > { %v1043_v24 = vpop.permute.xlu1 %1042 }
 0x354   : > { %1063 = vmatpush.msrb.mxu0 %v1043_v24 }
 0x356   : > { %v1453_v25 = vpop.eup %1452  ;;  %v697_v49 = vpop.f32.mrf.mxu2 }
 0x357   : > { %1343 = vmatmul.msk.f32.vlgmr.msrb.gmra.mxu0 %vm442_vm1, %v1453_v25  ;;  %v1037_v26 = vsel %vm442_vm1, %v1453_v25, 0.0  ;;  %v1455_v31 = vpop.eup %1454  ;;  %v721_v51 = vadd.f32 %v1830_v6, %v697_v49 }
 0x358   : > { %1038 = vadd.xlane.f32.xlu1 %v1037_v26  ;;  %v849_v33 = vmul.f32 0.0, %v1455_v31  ;;  %v1457_v38 = vpop.eup %1456 }
 0x359   : > { %v1036_v42 = vmul.f32 0.0, %v1457_v38 }
 0x3bd   : > { %v852_v35 = vpop.xlane.xlu0 %851 }
 0x3be   : > { %v853_v36 = vadd.f32 %v852_v35, %v849_v33 }
 0x3c0   : > { %1458 = vrcp.f32 %v853_v36 }
 0x3c6   : > { %v878_v37 = vpop.f32.mrf.mxu1  ;;  %v1459_v40 = vpop.eup %1458 }
 0x3c7   : > { %v881_v39 = vadd.f32 %v878_v37, %v849_v33 }
 0x3c9   : > { %v883_v41 = vmul.f32 %v1459_v40, %v881_v39 }
 0x3cb   : > { %v1039_v43 = vpop.xlane.xlu1 %1038  ;;  %1336 = vmatmul.msk.f32.vlgmr.msra.gmra.mxu2 %vm442_vm1, %v883_v41 }
 0x3cc   : > { %v1040_v44 = vadd.f32 %v1039_v43, %v1036_v42 }
 0x3ce   : > { %1460 = vrcp.f32 %v1040_v44 }
 0x3d4   : > { %v1065_v45 = vpop.f32.mrf.mxu0  ;;  %v1461_v47 = vpop.eup %1460 }
 0x3d5   : > { %v1068_v46 = vadd.f32 %v1065_v45, %v1036_v42 }
 0x3d7   : > { %v1070_v48 = vmul.f32 %v1461_v47, %v1068_v46 }
 0x3d9   : > { %1344 = vmatmul.msk.f32.vlgmr.msrb.gmra.mxu1 %vm442_vm1, %v1070_v48 }
 0x44e   : > { %v906_v50 = vpop.f32.mrf.mxu2 }
 0x44f   : > { %v909_v52 = vadd.f32 %v906_v50, %v721_v51 }
 0x456   : > { %v1093_v54 = vpop.f32.mrf.mxu1 }
 0x457   : > { %v1096_v55 = vadd.f32 %v1093_v54, %v909_v52 }
 0x459   : > { %v1101_v56 = vadd.f32 %v1437_v53, %v1096_v55 }
 0x45b   : > { %1103 = vst.msk [vmem:[%s261_s7] sm:$0xff] %vm271_vm0, %v1101_v56 }
 0x45c   : > { %1579 = shalt.err (!%p1576_p13)
}
 0x45d   : > { %1359 = dma.vmem_to_hbm [thread:$0]  (%p1746_p0), %s1119_s8, 128, %s1121_s9, %s1105_s18  }
 0x45e PF: > { %s1132_s11 = sand.u32 1, %s1618_s15   ;;  %p1373_p2 = pnand %p1302_p6, %p1753_p5 }
 0x45f   : > { %s1133_s28 = scalar_lea.sflag [#allocation7], %s1132_s11 }
 0x460   : > { %p1374_p4 = pneg %p1373_p2 }
 0x462   : > { %1613 = dma.done.wait (%p1374_p4), %s1133_s28, 128  }
 0x463   : > { %1615 = vsyncadd (%p1374_p4), %s1133_s28, 4294967168  ;;  %s21_s20 = sadd.s32 1, %s1638_s20   ;;  %s1900_s15 = smov %s1622_s16 }
 0x464   : > { %p18_p7 = scmp.ge.s32.totalorder %s21_s20, 4   ;;  %s1901_s16 = smov %s1626_s17 }
 0x465   : > { %s1902_s17 = smov %s1751_s24  ;;  %s1903_s18 = smov %s1634_s19 }
 0x466   : > { %s1904_s19 = smov %s1906_s10  ;;  %20 = sbr.rel (!%p18_p7) target bundleno = 7 (0x7), region = 181 }
 0x46b   :  { %1139 = vsyncpa [#allocation6], 1 }
 0x46c   :  { %1141 = vsyncpa [#allocation6 + $0x1], 1 }
 0x46d   :  { %1142 = vsyncpa [#allocation9], 1 }
 0x46e   :  { %1143 = vsyncpa [#allocation7], 1 }
 0x46f   :  { %1145 = vsyncpa [#allocation7 + $0x1], 1 }

</bundles_post_ra>
